<compile_context>
chip_gen: v7x
topology: tpu7x:2x2x1
jax: 0.10.0
libtpu: 0.0.40
codegen_flags: <defaults>
</compile_context>

<pallas_src>
import functools

import jax
import jax.numpy as jnp
import numpy as np
from jax import lax
from jax.experimental import pallas as pl
from jax.experimental.pallas import tpu as pltpu


def _nonlocal_kernel(x_ref, wptg_ref, wmask_ref, o_ref,
                     th_ref, phi_ref, g_ref, z_ref,
                     *, ic, k, n, q_block, exp_dtype, recip_approx):
    """One image per grid step: fused convs -> q-block attention -> mask+res."""
    cdtype = wptg_ref.dtype
    num_q = n // q_block

    # --- fused conv_phi / conv_theta / conv_g: one (3ic, c) @ (c, hw) matmul ---
    xk = x_ref[0].astype(cdtype)                                   # (c, hw)
    ptg = jnp.dot(wptg_ref[...], xk,
                  preferred_element_type=jnp.float32).astype(cdtype)  # (3ic, hw)

    # --- repack the torch-view into row-stacked (c, n) operands in VMEM ---
    # Row order s*ic + r: any consistent ordering of the contracted c rows
    # gives the same attention, and this one makes each y-chunk a contiguous
    # row block of Z.  phi/g are pre-split by q block so the loop below only
    # does dynamic indexing on a leading (non-tiled) scratch axis.
    for s in range(k):
        rows = slice(s * ic, (s + 1) * ic)
        base = s * n
        th_ref[rows, :] = ptg[ic:2 * ic, base:base + n]
        for qi in range(num_q):
            cols = slice(base + qi * q_block, base + (qi + 1) * q_block)
            phi_ref[qi, rows, :] = ptg[0:ic, cols]
            g_ref[qi, rows, :] = ptg[2 * ic:3 * ic, cols]

    # --- attention, tiled over the contracted q axis (key blocks) ---
    # softmax(dim=1) normalizes over the *output* index p per column q, so each
    # q block's softmax is complete by itself: no running max / denominator.
    z_ref[...] = jnp.zeros_like(z_ref)

    @pl.loop(0, num_q)
    def _(qi):
        theta_s = th_ref[...]                                       # (c, n)
        phi_b = phi_ref[qi]                                         # (c, qB)
        g_b = g_ref[qi]                                             # (c, qB)
        att = lax.dot_general(theta_s, phi_b, (((0,), (0,)), ((), ())),
                              preferred_element_type=jnp.float32)   # (n, qB)
        m = jnp.max(att, axis=0, keepdims=True)                     # (1, qB)
        e = jnp.exp((att - m).astype(exp_dtype))                    # (n, qB)
        denom = jnp.sum(e, axis=0, keepdims=True, dtype=jnp.float32)
        inv = pl.reciprocal(denom, approx=recip_approx)             # (1, qB)
        gs = g_b * inv.astype(cdtype)                               # (c, qB)
        z_ref[...] += lax.dot_general(gs, e.astype(cdtype),
                                      (((1,), (1,)), ((), ())),
                                      preferred_element_type=jnp.float32)

    # --- conv_mask + residual, written per lane-aligned chunk ---
    wmask = wmask_ref[...]                                          # (c, ic)
    for s in range(k):
        sl = slice(s * n, (s + 1) * n)
        z_s = z_ref[s * ic:(s + 1) * ic, :].astype(cdtype)          # (ic, n)
        mask_s = jnp.dot(wmask, z_s, preferred_element_type=jnp.float32)
        o_ref[0, :, sl] = mask_s + x_ref[0, :, sl]


def _default_q_block(n):
    if n <= 512:
        return n
    for cand in (512, 256, 128):
        if n % cand == 0:
            return cand
    return n  # unreachable: n is a multiple of 128


def nonlocal_forward(x, w_phi, w_theta, w_g, w_mask, *,
                     matmul_dtype=jnp.bfloat16, q_block=None, exp_dtype=None):
    b, c, h, w = x.shape
    ic = c // 2
    hw = h * w

    # Static shape checks: the lane-block factorization of the torch views
    # requires these exactly -- fail loudly instead of silently mis-indexing.
    assert c % 2 == 0, "NonLocal requires an even channel count"
    assert (ic * hw) % c == 0, "torch .view(b, c, -1) is invalid for this shape"
    n = (ic * hw) // c
    k = hw // n
    assert k * n == hw and k * ic == c, "view factorization does not tile exactly"
    assert n % 128 == 0, "h*w//2 must be a multiple of 128 (TPU lane alignment)"
    assert ic % 8 == 0, "channel//2 must be a multiple of 8 (TPU sublane alignment)"

    if q_block is None:
        q_block = _default_q_block(n)
    assert n % q_block == 0 and q_block % 128 == 0, "bad q_block"
    num_q = n // q_block

    mm_is_f32 = np.dtype(matmul_dtype) == np.dtype(np.float32)
    if exp_dtype is None:
        kind = jax.devices()[0].device_kind.lower()
        pre_v6 = any(t in kind for t in ("v2", "v3", "v4", "v5"))
        exp_dtype = jnp.float32 if (pre_v6 or mm_is_f32) else jnp.bfloat16
    recip_approx = not mm_is_f32  # exact reciprocal on the f32 verification path

    x_flat = x.reshape(b, c, hw).astype(jnp.float32)
    # Fuse the three 1x1-conv weights into one (3*ic, c) operand (one MXU push,
    # one weight DMA).  Accumulation / softmax / residual stay f32 in-kernel.
    w_ptg = jnp.concatenate([w_phi, w_theta, w_g], axis=0).astype(matmul_dtype)
    w_mask_c = w_mask.astype(matmul_dtype)

    # VMEM budget: double-buffered in/out blocks + scratches + main temps.
    esize = np.dtype(matmul_dtype).itemsize
    io_block = c * hw * 4
    scratch_bytes = c * n * (3 * esize + 4)           # theta/phi/g stacks + Z
    temp_bytes = (3 * ic * hw * (4 + esize)           # f32 ptg + cdtype copy
                  + n * q_block * (4 + 2 * esize)     # att + e (+ matmul cast)
                  + 2 * c * n * 4)                    # Z read/add temporaries
    vmem_need = 4 * io_block + scratch_bytes + temp_bytes + 8 * ic * c * esize
    vmem_limit = int(min(max(vmem_need * 3 // 2, 32 * 1024 * 1024),
                         64 * 1024 * 1024))           # safe on v5e/v6e/v7x

    kernel = functools.partial(
        _nonlocal_kernel, ic=ic, k=k, n=n, q_block=q_block,
        exp_dtype=exp_dtype, recip_approx=recip_approx)

    fn = pl.pallas_call(
        kernel,
        out_shape=jax.ShapeDtypeStruct((b, c, hw), jnp.float32),
        grid_spec=pltpu.PrefetchScalarGridSpec(
            num_scalar_prefetch=0,
            grid=(b,),
            in_specs=[
                pl.BlockSpec((1, c, hw), lambda i: (i, 0, 0)),    # x
                pl.BlockSpec((3 * ic, c), lambda i: (0, 0)),      # fused w
                pl.BlockSpec((c, ic), lambda i: (0, 0)),          # w_mask
            ],
            out_specs=pl.BlockSpec((1, c, hw), lambda i: (i, 0, 0)),
            scratch_shapes=[
                pltpu.VMEM((c, n), matmul_dtype),                 # theta stack
                pltpu.VMEM((num_q, c, q_block), matmul_dtype),    # phi blocks
                pltpu.VMEM((num_q, c, q_block), matmul_dtype),    # g blocks
                pltpu.VMEM((c, n), jnp.float32),                  # Z accumulator
            ],
        ),
        compiler_params=pltpu.CompilerParams(
            dimension_semantics=("parallel",),
            vmem_limit_bytes=vmem_limit),
        # Output has exactly x_flat's shape/dtype and, because the in/out
        # BlockSpecs are IDENTICAL, each x block is fully resident in VMEM
        # before its (same-index) output block is written back -> safe to
        # reuse x_flat's HBM buffer.  Do not change one spec without the other.
        input_output_aliases={0: 0},
    )
    out_flat = fn(x_flat, w_ptg, w_mask_c)
    return out_flat.reshape(b, c, h, w)


def nonlocal_reference(x, w_phi, w_theta, w_g, w_mask):
    """Pure-JAX reference mirroring the PyTorch forward (including its views)."""
    b, c, h, w = x.shape
    ic = c // 2
    hp = lax.Precision.HIGHEST

    def conv1x1(inp, wt):
        return jnp.einsum('oc,bchw->bohw', wt, inp, precision=hp)

    x_phi = conv1x1(x, w_phi).reshape(b, c, -1)                         # (b, c, n)
    x_theta = conv1x1(x, w_theta).reshape(b, c, -1).transpose(0, 2, 1)  # (b, n, c)
    x_g = conv1x1(x, w_g).reshape(b, c, -1).transpose(0, 2, 1)          # (b, n, c)
    att = jnp.einsum('bnc,bcm->bnm', x_theta, x_phi, precision=hp)      # (b, n, n)
    att = jax.nn.softmax(att, axis=1)
    y = jnp.einsum('bnm,bmc->bnc', att, x_g, precision=hp)              # (b, n, c)
    y = y.transpose(0, 2, 1).reshape(b, ic, h, w)
    mask = conv1x1(y, w_mask)
    return mask + x


if __name__ == "__main__":
    key = jax.random.PRNGKey(0)

    def make_inputs(rng, b, c, h, w):
        ic = c // 2
        k1, k2, k3, k4, k5 = jax.random.split(rng, 5)
        x = jax.random.normal(k1, (b, c, h, w), jnp.float32)
        bnd_c = 1.0 / (c ** 0.5)
        bnd_ic = 1.0 / (ic ** 0.5)
        w_phi = jax.random.uniform(k2, (ic, c), jnp.float32, -bnd_c, bnd_c)
        w_theta = jax.random.uniform(k3, (ic, c), jnp.float32, -bnd_c, bnd_c)
        w_g = jax.random.uniform(k4, (ic, c), jnp.float32, -bnd_c, bnd_c)
        w_mask = jax.random.uniform(k5, (c, ic), jnp.float32, -bnd_ic, bnd_ic)
        return x, w_phi, w_theta, w_g, w_mask

    ka, kb = jax.random.split(key)

    # Case 1: b=2, c=16, 16x16 -> n=128, single q block.
    args1 = make_inputs(ka, 2, 16, 16, 16)
    ref1 = nonlocal_reference(*args1)

    out1_f32 = jax.block_until_ready(
        nonlocal_forward(*args1, matmul_dtype=jnp.float32))
    if not np.allclose(np.asarray(out1_f32), np.asarray(ref1),
                       atol=3e-3, rtol=3e-3):
        raise AssertionError("Pallas NonLocal (f32, case 1) mismatch vs reference")

    out1_bf16 = jax.block_until_ready(nonlocal_forward(*args1))
    if not np.allclose(np.asarray(out1_bf16), np.asarray(ref1),
                       atol=4e-2, rtol=4e-2):
        raise AssertionError("Pallas NonLocal (bf16, case 1) mismatch vs reference")

    # Case 2: b=2, c=16, 32x32 -> n=512; q_block=128 forces the key-block
    # tiling + Z accumulation path (4 q blocks per image).
    args2 = make_inputs(kb, 2, 16, 32, 32)
    ref2 = nonlocal_reference(*args2)

    out2_f32 = jax.block_until_ready(
        nonlocal_forward(*args2, matmul_dtype=jnp.float32, q_block=128))
    if not np.allclose(np.asarray(out2_f32), np.asarray(ref2),
                       atol=5e-3, rtol=5e-3):
        raise AssertionError("Pallas NonLocal (f32, tiled) mismatch vs reference")

    out2_bf16 = jax.block_until_ready(nonlocal_forward(*args2, q_block=128))
    if not np.allclose(np.asarray(out2_bf16), np.asarray(ref2),
                       atol=4e-2, rtol=4e-2):
        raise AssertionError("Pallas NonLocal (bf16, tiled) mismatch vs reference")

    print("KERNEL_OK")
</pallas_src>

<mosaic_0001>
module attributes {stable_mosaic.version = 11 : i64} {
  func.func @_nonlocal_kernel(%arg0: i32, %arg1: memref<1x16x256xf32, #tpu.memory_space<vmem>>, %arg2: memref<24x16xf32, #tpu.memory_space<vmem>>, %arg3: memref<16x8xf32, #tpu.memory_space<vmem>>, %arg4: memref<1x16x256xf32, #tpu.memory_space<vmem>>, %arg5: memref<16x128xf32, #tpu.memory_space<vmem>>, %arg6: memref<1x16x128xf32, #tpu.memory_space<vmem>>, %arg7: memref<1x16x128xf32, #tpu.memory_space<vmem>>, %arg8: memref<16x128xf32, #tpu.memory_space<vmem>>) attributes {dimension_semantics = [#tpu.dimension_semantics<parallel>], iteration_bounds = array<i64: 2>, scalar_prefetch = 0 : i64, scratch_operands = 4 : i64, tpu.core_type = #tpu.core_type<tc>, window_params = [{transform_indices = @transform_0, window_bounds = array<i64: 1, 16, 256>}, {pipeline_mode = #tpu.pipeline_mode<synchronous>, transform_indices = @transform_1, window_bounds = array<i64: 24, 16>}, {pipeline_mode = #tpu.pipeline_mode<synchronous>, transform_indices = @transform_2, window_bounds = array<i64: 16, 8>}, {transform_indices = @transform_3, window_bounds = array<i64: 1, 16, 256>}]} {
    %c0 = arith.constant 0 : index
    %c0_0 = arith.constant 0 : index
    %c0_1 = arith.constant 0 : index
    %0 = vector.load %arg1[%c0, %c0_0, %c0_1] : memref<1x16x256xf32, #tpu.memory_space<vmem>>, vector<1x16x256xf32>
    %1 = vector.shape_cast %0 : vector<1x16x256xf32> to vector<16x256xf32>
    %c0_2 = arith.constant 0 : index
    %c0_3 = arith.constant 0 : index
    %2 = vector.load %arg2[%c0_2, %c0_3] : memref<24x16xf32, #tpu.memory_space<vmem>>, vector<24x16xf32>
    %cst = arith.constant dense<0.000000e+00> : vector<24x256xf32>
    %3 = tpu.matmul %2, %1, %cst {dimension_numbers = #tpu.dot_dimension_numbers<[1], [0], [0], [1], [0, 0, 1, 1], [], []>} : vector<24x16xf32>, vector<16x256xf32>, vector<24x256xf32> -> vector<24x256xf32>
    %4 = vector.extract_strided_slice %3 {offsets = [8, 0], sizes = [8, 128], strides = [1, 1]} : vector<24x256xf32> to vector<8x128xf32>
    %c0_4 = arith.constant 0 : index
    %c0_5 = arith.constant 0 : index
    %5 = vector.load %arg5[%c0_4, %c0_5] : memref<16x128xf32, #tpu.memory_space<vmem>>, vector<8x128xf32>
    tpu.vector_store %arg5[%c0_4, %c0_5], %4 {strides = array<i32>} : memref<16x128xf32, #tpu.memory_space<vmem>>, vector<8x128xf32>,
    %6 = vector.extract_strided_slice %3 {offsets = [0, 0], sizes = [8, 128], strides = [1, 1]} : vector<24x256xf32> to vector<8x128xf32>
    %c0_6 = arith.constant 0 : index
    %c0_7 = arith.constant 0 : index
    %c0_8 = arith.constant 0 : index
    %7 = vector.load %arg6[%c0_6, %c0_7, %c0_8] : memref<1x16x128xf32, #tpu.memory_space<vmem>>, vector<1x8x128xf32>
    %8 = vector.shape_cast %7 : vector<1x8x128xf32> to vector<8x128xf32>
    %9 = vector.shape_cast %6 : vector<8x128xf32> to vector<1x8x128xf32>
    tpu.vector_store %arg6[%c0_6, %c0_7, %c0_8], %9 {strides = array<i32>} : memref<1x16x128xf32, #tpu.memory_space<vmem>>, vector<1x8x128xf32>,
    %10 = vector.extract_strided_slice %3 {offsets = [16, 0], sizes = [8, 128], strides = [1, 1]} : vector<24x256xf32> to vector<8x128xf32>
    %c0_9 = arith.constant 0 : index
    %c0_10 = arith.constant 0 : index
    %c0_11 = arith.constant 0 : index
    %11 = vector.load %arg7[%c0_9, %c0_10, %c0_11] : memref<1x16x128xf32, #tpu.memory_space<vmem>>, vector<1x8x128xf32>
    %12 = vector.shape_cast %11 : vector<1x8x128xf32> to vector<8x128xf32>
    %13 = vector.shape_cast %10 : vector<8x128xf32> to vector<1x8x128xf32>
    tpu.vector_store %arg7[%c0_9, %c0_10, %c0_11], %13 {strides = array<i32>} : memref<1x16x128xf32, #tpu.memory_space<vmem>>, vector<1x8x128xf32>,
    %14 = vector.extract_strided_slice %3 {offsets = [8, 128], sizes = [8, 128], strides = [1, 1]} : vector<24x256xf32> to vector<8x128xf32>
    %c8 = arith.constant 8 : index
    %c0_12 = arith.constant 0 : index
    %15 = vector.load %arg5[%c8, %c0_12] : memref<16x128xf32, #tpu.memory_space<vmem>>, vector<8x128xf32>
    tpu.vector_store %arg5[%c8, %c0_12], %14 {strides = array<i32>} : memref<16x128xf32, #tpu.memory_space<vmem>>, vector<8x128xf32>,
    %16 = vector.extract_strided_slice %3 {offsets = [0, 128], sizes = [8, 128], strides = [1, 1]} : vector<24x256xf32> to vector<8x128xf32>
    %c0_13 = arith.constant 0 : index
    %c8_14 = arith.constant 8 : index
    %c0_15 = arith.constant 0 : index
    %17 = vector.load %arg6[%c0_13, %c8_14, %c0_15] : memref<1x16x128xf32, #tpu.memory_space<vmem>>, vector<1x8x128xf32>
    %18 = vector.shape_cast %17 : vector<1x8x128xf32> to vector<8x128xf32>
    %19 = vector.shape_cast %16 : vector<8x128xf32> to vector<1x8x128xf32>
    tpu.vector_store %arg6[%c0_13, %c8_14, %c0_15], %19 {strides = array<i32>} : memref<1x16x128xf32, #tpu.memory_space<vmem>>, vector<1x8x128xf32>,
    %20 = vector.extract_strided_slice %3 {offsets = [16, 128], sizes = [8, 128], strides = [1, 1]} : vector<24x256xf32> to vector<8x128xf32>
    %c0_16 = arith.constant 0 : index
    %c8_17 = arith.constant 8 : index
    %c0_18 = arith.constant 0 : index
    %21 = vector.load %arg7[%c0_16, %c8_17, %c0_18] : memref<1x16x128xf32, #tpu.memory_space<vmem>>, vector<1x8x128xf32>
    %22 = vector.shape_cast %21 : vector<1x8x128xf32> to vector<8x128xf32>
    %23 = vector.shape_cast %20 : vector<8x128xf32> to vector<1x8x128xf32>
    tpu.vector_store %arg7[%c0_16, %c8_17, %c0_18], %23 {strides = array<i32>} : memref<1x16x128xf32, #tpu.memory_space<vmem>>, vector<1x8x128xf32>,
    %cst_19 = arith.constant 0.000000e+00 : f32
    %24 = vector.broadcast %cst_19 : f32 to vector<16x128xf32>
    %c0_20 = arith.constant 0 : index
    %c0_21 = arith.constant 0 : index
    %25 = vector.load %arg8[%c0_20, %c0_21] : memref<16x128xf32, #tpu.memory_space<vmem>>, vector<16x128xf32>
    tpu.vector_store %arg8[%c0_20, %c0_21], %24 {strides = array<i32>} : memref<16x128xf32, #tpu.memory_space<vmem>>, vector<16x128xf32>,
    %c0_i32 = arith.constant 0 : i32
    %c1_i32 = arith.constant 1 : i32
    %26 = arith.muli %c0_i32, %c1_i32 : i32
    %c0_i32_22 = arith.constant 0 : i32
    %27 = arith.addi %c0_i32_22, %26 : i32
    %c0_23 = arith.constant 0 : index
    %c0_24 = arith.constant 0 : index
    %28 = vector.load %arg5[%c0_23, %c0_24] : memref<16x128xf32, #tpu.memory_space<vmem>>, vector<16x128xf32>
    %29 = arith.index_cast %27 : i32 to index
    %c0_25 = arith.constant 0 : index
    %c0_26 = arith.constant 0 : index
    %30 = vector.load %arg6[%29, %c0_25, %c0_26] : memref<1x16x128xf32, #tpu.memory_space<vmem>>, vector<1x16x128xf32>
    %31 = vector.shape_cast %30 : vector<1x16x128xf32> to vector<16x128xf32>
    %32 = arith.index_cast %27 : i32 to index
    %c0_27 = arith.constant 0 : index
    %c0_28 = arith.constant 0 : index
    %33 = vector.load %arg7[%32, %c0_27, %c0_28] : memref<1x16x128xf32, #tpu.memory_space<vmem>>, vector<1x16x128xf32>
    %34 = vector.shape_cast %33 : vector<1x16x128xf32> to vector<16x128xf32>
    %cst_29 = arith.constant dense<0.000000e+00> : vector<128x128xf32>
    %35 = tpu.matmul %28, %31, %cst_29 {dimension_numbers = #tpu.dot_dimension_numbers<[0], [0], [1], [1], [0, 1, 1, 1], [], []>} : vector<16x128xf32>, vector<16x128xf32>, vector<128x128xf32> -> vector<128x128xf32>
    %cst_30 = arith.constant dense<0xFF800000> : vector<128xf32>
    %36 = vector.multi_reduction <maximumf>, %35, %cst_30 [0] : vector<128x128xf32> to vector<128xf32>
    %37 = vector.shape_cast %36 : vector<128xf32> to vector<1x128xf32>
    %38 = vector.broadcast %37 : vector<1x128xf32> to vector<128x128xf32>
    %39 = arith.subf %35, %38 : vector<128x128xf32>
    %40 = math.exp %39 : vector<128x128xf32>
    %cst_31 = arith.constant dense<0.000000e+00> : vector<128xf32>
    %41 = vector.multi_reduction <add>, %40, %cst_31 [0] : vector<128x128xf32> to vector<128xf32>
    %42 = vector.shape_cast %41 : vector<128xf32> to vector<1x128xf32>
    %43 = tpu.reciprocal %42 : vector<1x128xf32> -> vector<1x128xf32>
    %44 = vector.broadcast %43 : vector<1x128xf32> to vector<16x128xf32>
    %45 = arith.mulf %34, %44 : vector<16x128xf32>
    %c0_32 = arith.constant 0 : index
    %c0_33 = arith.constant 0 : index
    %46 = vector.load %arg8[%c0_32, %c0_33] : memref<16x128xf32, #tpu.memory_space<vmem>>, vector<16x128xf32>
    %cst_34 = arith.constant dense<0.000000e+00> : vector<16x128xf32>
    %47 = tpu.matmul %45, %40, %cst_34 {dimension_numbers = #tpu.dot_dimension_numbers<[1], [1], [0], [0], [0, 0, 1, 0], [], []>} : vector<16x128xf32>, vector<128x128xf32>, vector<16x128xf32> -> vector<16x128xf32>
    %48 = arith.addf %46, %47 : vector<16x128xf32>
    %c0_35 = arith.constant 0 : index
    %c0_36 = arith.constant 0 : index
    %49 = vector.load %arg8[%c0_35, %c0_36] : memref<16x128xf32, #tpu.memory_space<vmem>>, vector<16x128xf32>
    tpu.vector_store %arg8[%c0_35, %c0_36], %48 {strides = array<i32>} : memref<16x128xf32, #tpu.memory_space<vmem>>, vector<16x128xf32>,
    %c1_i32_37 = arith.constant 1 : i32
    %c0_38 = arith.constant 0 : index
    %c0_39 = arith.constant 0 : index
    %50 = vector.load %arg3[%c0_38, %c0_39] : memref<16x8xf32, #tpu.memory_space<vmem>>, vector<16x8xf32>
    %c0_40 = arith.constant 0 : index
    %c0_41 = arith.constant 0 : index
    %51 = vector.load %arg8[%c0_40, %c0_41] : memref<16x128xf32, #tpu.memory_space<vmem>>, vector<8x128xf32>
    %cst_42 = arith.constant dense<0.000000e+00> : vector<16x128xf32>
    %52 = tpu.matmul %50, %51, %cst_42 {dimension_numbers = #tpu.dot_dimension_numbers<[1], [0], [0], [1], [0, 0, 1, 1], [], []>} : vector<16x8xf32>, vector<8x128xf32>, vector<16x128xf32> -> vector<16x128xf32>
    %c0_43 = arith.constant 0 : index
    %c0_44 = arith.constant 0 : index
    %c0_45 = arith.constant 0 : index
    %53 = vector.load %arg1[%c0_43, %c0_44, %c0_45] : memref<1x16x256xf32, #tpu.memory_space<vmem>>, vector<1x16x128xf32>
    %54 = vector.shape_cast %53 : vector<1x16x128xf32> to vector<16x128xf32>
    %55 = arith.addf %52, %54 : vector<16x128xf32>
    %c0_46 = arith.constant 0 : index
    %c0_47 = arith.constant 0 : index
    %c0_48 = arith.constant 0 : index
    %56 = vector.load %arg4[%c0_46, %c0_47, %c0_48] : memref<1x16x256xf32, #tpu.memory_space<vmem>>, vector<1x16x128xf32>
    %57 = vector.shape_cast %56 : vector<1x16x128xf32> to vector<16x128xf32>
    %58 = vector.shape_cast %55 : vector<16x128xf32> to vector<1x16x128xf32>
    tpu.vector_store %arg4[%c0_46, %c0_47, %c0_48], %58 {strides = array<i32>} : memref<1x16x256xf32, #tpu.memory_space<vmem>>, vector<1x16x128xf32>,
    %c8_49 = arith.constant 8 : index
    %c0_50 = arith.constant 0 : index
    %59 = vector.load %arg8[%c8_49, %c0_50] : memref<16x128xf32, #tpu.memory_space<vmem>>, vector<8x128xf32>
    %cst_51 = arith.constant dense<0.000000e+00> : vector<16x128xf32>
    %60 = tpu.matmul %50, %59, %cst_51 {dimension_numbers = #tpu.dot_dimension_numbers<[1], [0], [0], [1], [0, 0, 1, 1], [], []>} : vector<16x8xf32>, vector<8x128xf32>, vector<16x128xf32> -> vector<16x128xf32>
    %c0_52 = arith.constant 0 : index
    %c0_53 = arith.constant 0 : index
    %c128 = arith.constant 128 : index
    %61 = vector.load %arg1[%c0_52, %c0_53, %c128] : memref<1x16x256xf32, #tpu.memory_space<vmem>>, vector<1x16x128xf32>
    %62 = vector.shape_cast %61 : vector<1x16x128xf32> to vector<16x128xf32>
    %63 = arith.addf %60, %62 : vector<16x128xf32>
    %c0_54 = arith.constant 0 : index
    %c0_55 = arith.constant 0 : index
    %c128_56 = arith.constant 128 : index
    %64 = vector.load %arg4[%c0_54, %c0_55, %c128_56] : memref<1x16x256xf32, #tpu.memory_space<vmem>>, vector<1x16x128xf32>
    %65 = vector.shape_cast %64 : vector<1x16x128xf32> to vector<16x128xf32>
    %66 = vector.shape_cast %63 : vector<16x128xf32> to vector<1x16x128xf32>
    tpu.vector_store %arg4[%c0_54, %c0_55, %c128_56], %66 {strides = array<i32>} : memref<1x16x256xf32, #tpu.memory_space<vmem>>, vector<1x16x128xf32>,
    return
  }
  func.func @transform_0(%arg0: i32) -> (i32, i32, i32) {
    %c0_i32 = arith.constant 0 : i32
    %c0_i32_0 = arith.constant 0 : i32
    %c0_i32_1 = arith.constant 0 : i32
    return %arg0, %c0_i32, %c0_i32_0 : i32, i32, i32
  }
  func.func @transform_1(%arg0: i32) -> (i32, i32) {
    %c0_i32 = arith.constant 0 : i32
    %c0_i32_0 = arith.constant 0 : i32
    %c0_i32_1 = arith.constant 0 : i32
    return %c0_i32, %c0_i32_0 : i32, i32
  }
  func.func @transform_2(%arg0: i32) -> (i32, i32) {
    %c0_i32 = arith.constant 0 : i32
    %c0_i32_0 = arith.constant 0 : i32
    %c0_i32_1 = arith.constant 0 : i32
    return %c0_i32, %c0_i32_0 : i32, i32
  }
  func.func @transform_3(%arg0: i32) -> (i32, i32, i32) {
    %c0_i32 = arith.constant 0 : i32
    %c0_i32_0 = arith.constant 0 : i32
    %c0_i32_1 = arith.constant 0 : i32
    return %arg0, %c0_i32, %c0_i32_0 : i32, i32, i32
  }
}

</mosaic_0001>

<bundles_post_ra>
// kernel: tpu_custom_call.1
= control target key start
LH: loop header
LB: loop body
LE: loop exit
PB: predicated region body
PF: predicated region fallthrough
CT: control target
= control target key end

     0   :  { %8 = vsyncpa [#allocation7], 0  ;;  %s1584_s0 = inlined_call_operand.hbm [shape: f32[2,16,256], index: 0, kind: input, shape index: {}, may-alias: {0,3}]   ;;  %s1585_s1 = inlined_call_operand.vmem [shape: f32[24,16], index: 1, kind: input, shape index: {}]   ;;  %s1586_s2 = inlined_call_operand.vmem [shape: f32[16,8], index: 2, kind: input, shape index: {}]   ;;  %s1587_s3 = inlined_call_operand.hbm [shape: f32[2,16,256], index: 3, kind: output, shape index: {}, may-alias: {0,3}]  }
   0x1   :  { %10 = vsyncpa [#allocation7 + $0x1], 0 }
   0x2   :  { %11 = vsyncpa [#allocation8], 0 }
   0x3   :  { %13 = vsyncpa [#allocation8 + $0x1], 0  ;;  %s1362_s12 = smov 0   ;;  %s1364_s13 = smov 0  }
   0x4   :  { %s1366_s14 = smov 0   ;;  %s1368_s15 = smov 0  }
   0x5 LB: > { %s1383_s16 = sadd.s32 4294967295, %s1333_s15   ;;  %s958_s17 = sadd.s32 4294967294, %s1333_s15   ;;  %s1333_s15 = sphi %s1368_s15, %s1600_s15   ;;  %s1329_s14 = sphi %s1366_s14, %s1599_s14   ;;  %s1325_s13 = sphi %s1364_s13, %s1598_s13   ;;  %s1321_s12 = sphi %s1362_s12, %s1597_s12  }
   0x6   : > { %s1387_s18 = sadd.s32 1, %s1333_s15   ;;  %s26_s19 = sadd.s32 1, %s1329_s14 }
   0x7   : > { %s23_s20 = ssub.s32 %s1333_s15, %s1387_s18  ;;  %p33_p0 = scmp.ne.s32.totalorder %s1329_s14, %s1325_s13 }
   0x8   : > { %p24_p1 = scmp.eq.s32.totalorder %s23_s20, 0  ;;  %p34_p2 = scmp.eq.s32.totalorder %s1333_s15, 0 }
   0x9   : > { %p39_p3 = scmp.ne.s32.totalorder %s1325_s13, %s1321_s12  ;;  %p40_p4 = scmp.eq.s32.totalorder %s1383_s16, 0 }
   0xa   : > { %s1399_s21 = scalar_select %p24_p1, %s1329_s14, %s26_s19  }
   0xb   : > { %p1401_p5 = por %p34_p2, %p33_p0  ;;  %p1405_p6 = por %p40_p4, %p39_p3 }
   0xc   : > { %p105_p7 = scmp.eq.s32.totalorder %s1383_s16, 1  ;;  %p111_p8 = scmp.eq.s32.totalorder %s958_s17, 1 }
   0xd   : > { %p1164_p10 = scmp.lt.s32.totalorder %s1333_s15, 2  ;;  %s137_s26 = sand.u32 1, %s1329_s14  }
   0xe   : > { %p1412_p11 = por %p105_p7, %p33_p0  ;;  %p1416_p12 = por %p111_p8, %p39_p3 }
   0xf   : > { %s995_s27 = sshll.u32 %s1333_s15, 9  ;;  %s961_s28 = sshll.u32 %s137_s26, 5 }
  0x10   : > { %s1591_s24 = scalar_select %p1412_p11, 1, 0 }
  0x11   : > { %s1592_s25 = scalar_select %p1416_p12, 1, 0 }
  0x12   : > { %s1425_s4 = scalar_lea.hbm %s1584_s0, %s995_s27  ;;  %s141_s5 = scalar_lea.vmem [#allocation6], %s961_s28 }
  0x13   : > { %s148_s6 = sshll.u32 %s141_s5, 4  ;;  %p1429_p13 = pnand %p1164_p10, %p1401_p5  ;;  %s1433_s6 = int_to_ptr.vmem [resolvable:$true] %s148_s6 }
  0x14   : > { %s1435_s8 = scalar_lea.sflag [#allocation7], %s137_s26  ;;  %s1237_s9 = scalar_lea.hbm %s1425_s4, 512 }
  0x15   : > { %p1238_p0 = scmp.ne.s32.totalorder %s1425_s4, %s1237_s9  ;;  %p1239_p1 = pneg %p1429_p13 }
  0x16   : > { %s1242_s17 = scalar_lea.hbm %s1584_s0, 1024  ;;  %p1243_p4 = scmp.lt.u32.totalorder %s1425_s4, %s1584_s0 }
  0x17   : > { %p1240_p2 = pnand %p1239_p1, %p1238_p0  ;;  %p1244_p5 = scmp.lt.u32.totalorder %s1242_s17, %s1237_s9 }
  0x18   : > { %p1246_p8 = scmp.lt.u32.totalorder %s1237_s9, %s1425_s4 }
  0x19   : > { %p1241_p3 = pneg %p1240_p2  ;;  %p1245_p7 = por %p1244_p5, %p1243_p4 }
  0x1b   : > { %p1247_p10 = por %p1246_p8, %p1245_p7 }
  0x1d   : > { %p1248_p9 = pnand %p1247_p10, %p1241_p3 }
  0x1f   : > { %1251 = shalt.err (!%p1248_p9)
}
  0x20   : > { %s1252_s22 = scalar_lea.vmem %s1433_s6, 512  ;;  %s1335_s26 = smov [#allocation6]  }
  0x21   : > { %p1253_p0 = scmp.ne.s32.totalorder %s1433_s6, %s1252_s22  ;;  %s1257_s27 = sshll.u32 %s1335_s26, 4  ;;  %s1258_s27 = int_to_ptr.vmem [resolvable:$false] %s1257_s27 }
  0x22   : > { %s1259_s28 = scalar_lea.vmem %s1258_s27, 1024  ;;  %p1260_p11 = scmp.lt.s32.totalorder %s1433_s6, %s1258_s27 }
  0x23   : > { %p1255_p2 = pnand %p1253_p0, %p1239_p1  ;;  %p1261_p4 = scmp.lt.s32.totalorder %s1259_s28, %s1252_s22 }
  0x25   : > { %p1256_p12 = pneg %p1255_p2  ;;  %p1262_p5 = por %p1261_p4, %p1260_p11 }
  0x27   : > { %p1263_p7 = pnand %p1262_p5, %p1256_p12 }
  0x29   : > { %1266 = shalt.err (!%p1263_p7)
}
  0x2a   : > { %s1336_s29 = smov 256   ;;  %s1337_s30 = smov 16  }
  0x2b   : > { %1159 = dma.hbm_to_vmem [thread:$0]  (!%p1429_p13), %s1425_s4, 512, %s1433_s6, %s1435_s8, %s1336_s29, %s1336_s29, %s1337_s30  }
  0x2c   : > { %p964_p9 = scmp.ge.s32.totalorder %s1333_s15, 1  ;;  %p156_p1 = scmp.lt.s32.totalorder %s1333_s15, 3 }
  0x2e   : > { %p157_p3 = pnand %p964_p9, %p156_p1 }
  0x2f   : > { %s1466_s5 = sand.u32 (!%p157_p3), 1, %s1325_s13  }
  0x30   : > { %160 = sbr.rel (%p157_p3) target bundleno = 1231 (0x4cf), region = 32  ;;  %s965_s9 = sshll.u32 (!%p157_p3), %s1466_s5, 5 }
  0x31   : > { %s163_s10 = scalar_lea.sflag (!%p157_p3), [#allocation7], %s1466_s5  ;;  %s166_s11 = scalar_lea.vmem (!%p157_p3), [#allocation6], %s965_s9 }
  0x37   : > { %1312 = dma.done.wait (%p1405_p6), %s163_s10, 512  }
  0x38   : > { %1314 = vsyncadd (%p1405_p6), %s163_s10, 4294966784  ;;  %v1338_v0 = vmov 0.0   ;;  %v1476_v1 = vld [vmem:[%s166_s11 + $0x8] sm:$0xff]  ;;  %v1478_v2 = vld [vmem:[%s166_s11 + $0x18] sm:$0xff]  ;;  %vm196_vm0 = vcmask 130048   ;;  %vm707_vm1 = vcmask 64512  }
  0x39   : > { %270 = vmatprep.mubr.f32.mxu1 %v1338_v0  ;;  %v1480_v3 = vld [vmem:[%s166_s11] sm:$0xff]  ;;  %v1112_v4 = vpack.c.bf16 %v1478_v2, %v1476_v1  ;;  %v1484_v5 = vld [vmem:[%s166_s11 + $0x10] sm:$0xff]  ;;  %v194_v8 = vld [vmem:[%s1585_s1 + $0x8] sm:$0xff]  ;;  %s188_s27 = scalar_lea.vmem [#allocation9], %s965_s9  ;;  %s996_s29 = sshll.u32 %s1383_s16, 9 }
  0x3a   : > { %v1114_v6 = vpack.c.bf16 %v1484_v5, %v1480_v3  ;;  %v193_v7 = vld [vmem:[%s1585_s1] sm:$0xff]  ;;  %v195_v9 = vld [vmem:[%s1585_s1 + $0x10] sm:$0xff]  ;;  %s885_s28 = sshll.u32 %s188_s27, 4  ;;  %s1539_s9 = scalar_lea.hbm %s1587_s3, %s996_s29  ;;  %s1533_s28 = int_to_ptr.vmem [resolvable:$true] %s885_s28 }
  0x3b   : > { %1113 = vmatprep.subr.bf16.mxu1 %v1112_v4  ;;  %s872_s16 = scalar_lea.sflag [#allocation8], %s1466_s5  ;;  %s1267_s11 = scalar_lea.vmem %s1533_s28, 512 }
  0x3c   : > { %1115 = vmatpush1.bf16.msra.mxu1 %v1114_v6  ;;  %p1268_p6 = scmp.ne.s32.totalorder %s1533_s28, %s1267_s11  ;;  %p1594_p11 = scmp.ne.s32.totalorder %s1591_s24, 0 }
  0x3d   : > { %s1339_s23 = smov [#allocation9]  }
  0x3e   : > { %p1269_p12 = pnand %p1268_p6, %p1594_p11  ;;  %s1271_s4 = sshll.u32 %s1339_s23, 4  ;;  %s1272_s4 = int_to_ptr.vmem [resolvable:$false] %s1271_s4 }
  0x3f   : > { %967 = vmatmul.mubr.msk.f32.vlgmr.msra.gmra.mrb[0].mxu1 %vm196_vm0, %v193_v7  ;;  %s1273_s6 = scalar_lea.vmem %s1272_s4, 1024  ;;  %p1274_p8 = scmp.lt.s32.totalorder %s1533_s28, %s1272_s4 }
  0x40   : > { %276 = vmatprep.mubr.f32.mxu1 %v1338_v0  ;;  %p1270_p13 = pneg %p1269_p12  ;;  %p1275_p10 = scmp.lt.s32.totalorder %s1273_s6, %s1267_s11 }
  0x42   : > { %p1276_p0 = por %p1275_p10, %p1274_p8 }
  0x43   : > { %968 = vmatmul.mubr.msk.f32.gmra.mrb[2].mxu1 %vm196_vm0, %v194_v8 }
  0x44   : > { %282 = vmatprep.mubr.f32.mxu1 %v1338_v0  ;;  %p1277_p2 = pnand %p1276_p0, %p1270_p13 }
  0x47   : > { %969 = vmatmul.mubr.msk.f32.gmra.mrb[4].mxu1 %vm196_vm0, %v195_v9 }
 0x112   : > { %v272_v10 = vpop.f32.mrb[0].mxu1 }
 0x113   : > { %v274_v11 = vpop.f32.mrb[1].mxu1 }
 0x114   : > { %v1116_v12 = vpack.c.bf16 %v274_v11, %v272_v10 }
 0x116   : > { %v278_v13 = vpop.f32.mrb[2].mxu1  ;;  %1117 = vmatprep.subr.bf16.mxu1 %v1116_v12 }
 0x117   : > { %1119 = vmatpush3.bf16.msra.mxu1 %v1116_v12  ;;  %303 = vxpose.xlu0.b32.start [1/2] (short) %v278_v13, 128  ;;  %v280_v14 = vpop.f32.mrb[3].mxu1 }
 0x11a   : > { %v1500_v15 = vpop.f32.mrb[4].mxu1 }
 0x11b   : > { %304 = vxpose.xlu0.b32.end [2/2] (short) %v280_v14, 128  ;;  %v1502_v16 = vpop.f32.mrb[5].mxu1 }
 0x197   : > { %v319_v17 = vpop.trf.xlu0 }
 0x198   : > { %1043 = vmatprep.mubr.msk.f32.mxu1 %vm196_vm0, %v319_v17 }
 0x19b   : > { %v320_v18 = vpop.trf.xlu0 }
 0x19c   : > { %1044 = vmatmul.mubr.msk.f32.vlgmr.msra.gmra.mrb[6].mxu1 %vm196_vm0, %v320_v18 }
 0x19f   : > { %v321_v19 = vpop.trf.xlu0 }
 0x1a0   : > { %1046 = vmatprep.mubr.msk.f32.mxu1 %vm196_vm0, %v321_v19 }
 0x1a3   : > { %v322_v20 = vpop.trf.xlu0 }
 0x1a4   : > { %1047 = vmatmul.mubr.msk.f32.gmra.mrb[8].mxu1 %vm196_vm0, %v322_v20 }
 0x1a7   : > { %v323_v21 = vpop.trf.xlu0 }
 0x1a8   : > { %1049 = vmatprep.mubr.msk.f32.mxu1 %vm196_vm0, %v323_v21 }
 0x1ab   : > { %v324_v22 = vpop.trf.xlu0 }
 0x1ac   : > { %1050 = vmatmul.mubr.msk.f32.gmra.mrb[10].mxu1 %vm196_vm0, %v324_v22 }
 0x1af   : > { %v325_v23 = vpop.trf.xlu0 }
 0x1b0   : > { %1052 = vmatprep.mubr.msk.f32.mxu1 %vm196_vm0, %v325_v23 }
 0x1b3   : > { %v326_v24 = vpop.trf.xlu0 }
 0x1b4   : > { %1053 = vmatmul.mubr.msk.f32.gmra.mrb[12].mxu1 %vm196_vm0, %v326_v24 }
 0x1b7   : > { %v327_v25 = vpop.trf.xlu0 }
 0x1b8   : > { %1055 = vmatprep.mubr.msk.f32.mxu1 %vm196_vm0, %v327_v25 }
 0x1bb   : > { %v328_v26 = vpop.trf.xlu0 }
 0x1bc   : > { %1056 = vmatmul.mubr.msk.f32.gmra.mrb[14].mxu1 %vm196_vm0, %v328_v26 }
 0x1bf   : > { %v329_v27 = vpop.trf.xlu0 }
 0x1c0   : > { %1058 = vmatprep.mubr.msk.f32.mxu1 %vm196_vm0, %v329_v27 }
 0x1c3   : > { %v330_v28 = vpop.trf.xlu0 }
 0x1c4   : > { %1059 = vmatmul.mubr.msk.f32.gmra.mrb[16].mxu1 %vm196_vm0, %v330_v28 }
 0x1c7   : > { %v331_v29 = vpop.trf.xlu0 }
 0x1c8   : > { %1061 = vmatprep.mubr.msk.f32.mxu1 %vm196_vm0, %v331_v29 }
 0x1cb   : > { %v332_v30 = vpop.trf.xlu0 }
 0x1cc   : > { %1062 = vmatmul.mubr.msk.f32.gmra.mrb[18].mxu1 %vm196_vm0, %v332_v30 }
 0x1cf   : > { %v333_v31 = vpop.trf.xlu0 }
 0x1d0   : > { %1064 = vmatprep.mubr.msk.f32.mxu1 %vm196_vm0, %v333_v31 }
 0x1d3   : > { %v334_v32 = vpop.trf.xlu0 }
 0x1d4   : > { %1065 = vmatmul.mubr.msk.f32.gmra.mrb[20].mxu1 %vm196_vm0, %v334_v32 }
 0x26f   : > { %v1045_v33 = vpop.f32.mrb[6].mxu1 }
 0x270   : > { %v449_v34 = vpop.f32.mrb[7].mxu1 }
 0x277   : > { %v1048_v35 = vpop.f32.mrb[8].mxu1 }
 0x278   : > { %v459_v36 = vpop.f32.mrb[9].mxu1 }
 0x27f   : > { %v1051_v37 = vpop.f32.mrb[10].mxu1 }
 0x280   : > { %v529_v38 = vmax.f32 %v1045_v33, %v1051_v37  ;;  %v469_v39 = vpop.f32.mrb[11].mxu1 }
 0x281   : > { %v528_v40 = vmax.f32 %v449_v34, %v469_v39 }
 0x287   : > { %v1054_v41 = vpop.f32.mrb[12].mxu1 }
 0x288   : > { %v531_v42 = vmax.f32 %v1048_v35, %v1054_v41  ;;  %v479_v43 = vpop.f32.mrb[13].mxu1 }
 0x289   : > { %v530_v44 = vmax.f32 %v459_v36, %v479_v43 }
 0x28f   : > { %v1057_v45 = vpop.f32.mrb[14].mxu1 }
 0x290   : > { %v533_v46 = vmax.f32 %v529_v38, %v1057_v45  ;;  %v489_v47 = vpop.f32.mrb[15].mxu1 }
 0x291   : > { %v532_v48 = vmax.f32 %v528_v40, %v489_v47 }
 0x297   : > { %v1060_v49 = vpop.f32.mrb[16].mxu1 }
 0x298   : > { %v535_v50 = vmax.f32 %v531_v42, %v1060_v49  ;;  %v499_v51 = vpop.f32.mrb[17].mxu1 }
 0x299   : > { %v534_v52 = vmax.f32 %v530_v44, %v499_v51 }
 0x29f   : > { %v1063_v53 = vpop.f32.mrb[18].mxu1 }
 0x2a0   : > { %v537_v54 = vmax.f32 %v533_v46, %v1063_v53  ;;  %v509_v55 = vpop.f32.mrb[19].mxu1 }
 0x2a1   : > { %v536_v56 = vmax.f32 %v532_v48, %v509_v55 }
 0x2a3   : > { %v540_v57 = vmax.f32 %v536_v56, %v537_v54 }
 0x2a7   : > { %v1066_v58 = vpop.f32.mrb[20].mxu1 }
 0x2a8   : > { %v539_v59 = vmax.f32 %v535_v50, %v1066_v58  ;;  %v519_v60 = vpop.f32.mrb[21].mxu1 }
 0x2a9   : > { %v538_v61 = vmax.f32 %v534_v52, %v519_v60 }
 0x2ab   : > { %v541_v62 = vmax.f32 %v538_v61, %v539_v59 }
 0x2ad   : > { %v542_v63 = vmax.f32 %v540_v57, %v541_v62 }
 0x2af   : > { %v543_v0 = vrot.slane %v542_v63, 4 }
 0x2b1   : > { %v544_v4 = vmax.f32 %v542_v63, %v543_v0 }
 0x2b3   : > { %v545_v6 = vrot.slane %v544_v4, 2 }
 0x2b5   : > { %v546_v7 = vmax.f32 %v544_v4, %v545_v6 }
 0x2b7   : > { %v547_v8 = vrot.slane %v546_v7, 1 }
 0x2b9   : > { %v548_v9 = vmax.f32 %v546_v7, %v547_v8 }
 0x2bb   : > { %v563_v10 = vsub.f32 %v519_v60, %v548_v9  ;;  %v549_v11 = vsub.f32 %v449_v34, %v548_v9  ;;  %v550_v12 = vsub.f32 %v1045_v33, %v548_v9  ;;  %v551_v13 = vsub.f32 %v459_v36, %v548_v9 }
 0x2bc   : > { %v552_v14 = vsub.f32 %v1048_v35, %v548_v9  ;;  %v553_v17 = vsub.f32 %v469_v39, %v548_v9  ;;  %v554_v18 = vsub.f32 %v1051_v37, %v548_v9  ;;  %v555_v19 = vsub.f32 %v479_v43, %v548_v9 }
 0x2bd   : > { %v593_v20 = vmul.f32 1.442695, %v563_v10  ;;  %v565_v21 = vmul.f32 1.442695, %v549_v11  ;;  %v567_v22 = vmul.f32 1.442695, %v550_v12  ;;  %v556_v23 = vsub.f32 %v1054_v41, %v548_v9 }
 0x2be   : > { %v569_v24 = vmul.f32 1.442695, %v551_v13  ;;  %v557_v25 = vsub.f32 %v489_v47, %v548_v9  ;;  %v571_v26 = vmul.f32 1.442695, %v552_v14  ;;  %v573_v27 = vmul.f32 1.442695, %v553_v17 }
 0x2bf   : > { %1203 = vpow2.f32 %v593_v20  ;;  %v575_v28 = vmul.f32 1.442695, %v554_v18  ;;  %v558_v29 = vsub.f32 %v1057_v45, %v548_v9  ;;  %v559_v30 = vsub.f32 %v499_v51, %v548_v9 }
 0x2c0   : > { %1205 = vpow2.f32 %v565_v21  ;;  %v560_v31 = vsub.f32 %v1060_v49, %v548_v9  ;;  %v561_v32 = vsub.f32 %v509_v55, %v548_v9  ;;  %v562_v33 = vsub.f32 %v1063_v53, %v548_v9 }
 0x2c1   : > { %1207 = vpow2.f32 %v567_v22  ;;  %v577_v34 = vmul.f32 1.442695, %v555_v19  ;;  %v564_v35 = vsub.f32 %v1066_v58, %v548_v9  ;;  %v579_v36 = vmul.f32 1.442695, %v556_v23 }
 0x2c2   : > { %1209 = vpow2.f32 %v569_v24  ;;  %v581_v37 = vmul.f32 1.442695, %v557_v25  ;;  %v583_v38 = vmul.f32 1.442695, %v558_v29  ;;  %v585_v39 = vmul.f32 1.442695, %v559_v30 }
 0x2c3   : > { %1211 = vpow2.f32 %v571_v26  ;;  %v587_v40 = vmul.f32 1.442695, %v560_v31  ;;  %v589_v41 = vmul.f32 1.442695, %v561_v32  ;;  %v591_v43 = vmul.f32 1.442695, %v562_v33 }
 0x2c4   : > { %1213 = vpow2.f32 %v573_v27  ;;  %v595_v45 = vmul.f32 1.442695, %v564_v35 }
 0x2c5   : > { %1215 = vpow2.f32 %v575_v28 }
 0x2c6   : > { %1217 = vpow2.f32 %v577_v34  ;;  %v702_v34 = vld [vmem:[%s1586_s2] sm:$0xff] }
 0x2c7   : > { %1219 = vpow2.f32 %v579_v36  ;;  %1104 = vmatprep.mubr.msk.f32.mxu1 %vm707_vm1, %v702_v34 }
 0x2c8   : > { %1221 = vpow2.f32 %v581_v37  ;;  %v703_v37 = vld [vmem:[%s1586_s2 + $0x8] sm:$0xff] }
 0x2c9   : > { %v1204_v42 = vpop.eup %1203  ;;  %1223 = vpow2.f32 %v583_v38 }
 0x2ca   : > { %v1206_v44 = vpop.eup %1205  ;;  %1225 = vpow2.f32 %v585_v39 }
 0x2cb   : > { %v1208_v46 = vpop.eup %1207  ;;  %1227 = vpow2.f32 %v587_v40 }
 0x2cc   : > { %v1210_v47 = vpop.eup %1209  ;;  %v597_v48 = vadd.f32 %v1208_v46, %v1206_v44  ;;  %v1120_v49 = vpack.c.bf16 %v1208_v46, %v1206_v44  ;;  %1229 = vpow2.f32 %v589_v41 }
 0x2cd   : > { %v1212_v50 = vpop.eup %1211  ;;  %1231 = vpow2.f32 %v591_v43 }
 0x2ce   : > { %v1214_v51 = vpop.eup %1213  ;;  %1121 = vmatprep.subr.bf16.mxu0 %v1120_v49  ;;  %v598_v52 = vadd.f32 %v1210_v47, %v597_v48  ;;  %v1124_v53 = vpack.c.bf16 %v1212_v50, %v1210_v47  ;;  %1233 = vpow2.f32 %v595_v45 }
 0x2cf   : > { %v1216_v54 = vpop.eup %1215  ;;  %1123 = vmatpush3.bf16.xpose.msra.mxu0 %v1120_v49 }
 0x2d0   : > { %v1218_v55 = vpop.eup %1217  ;;  %v599_v56 = vadd.f32 %v1212_v50, %v598_v52  ;;  %1125 = vmatprep.subr.bf16.mxu0 %v1124_v53  ;;  %v1128_v57 = vpack.c.bf16 %v1216_v54, %v1214_v51 }
 0x2d1   : > { %v1220_v58 = vpop.eup %1219 }
 0x2d2   : > { %v1222_v59 = vpop.eup %1221  ;;  %v600_v60 = vadd.f32 %v1214_v51, %v599_v56  ;;  %v1132_v61 = vpack.c.bf16 %v1220_v58, %v1218_v55 }
 0x2d3   : > { %v1224_v62 = vpop.eup %1223 }
 0x2d4   : > { %v1226_v63 = vpop.eup %1225  ;;  %v601_v0 = vadd.f32 %v1216_v54, %v600_v60  ;;  %v1136_v4 = vpack.c.bf16 %v1224_v62, %v1222_v59 }
 0x2d5   : > { %v1228_v6 = vpop.eup %1227 }
 0x2d6   : > { %v1230_v7 = vpop.eup %1229  ;;  %v602_v8 = vadd.f32 %v1218_v55, %v601_v0  ;;  %v1140_v9 = vpack.c.bf16 %v1228_v6, %v1226_v63 }
 0x2d7   : > { %v1232_v10 = vpop.eup %1231  ;;  %1127 = vmatpush3.bf16.xpose.msra.mxu0 %v1124_v53 }
 0x2d8   : > { %v1234_v11 = vpop.eup %1233  ;;  %1129 = vmatprep.subr.bf16.mxu0 %v1128_v57  ;;  %v603_v12 = vadd.f32 %v1220_v58, %v602_v8  ;;  %v1144_v13 = vpack.c.bf16 %v1232_v10, %v1230_v7 }
 0x2d9   : > { %v1148_v14 = vpack.c.bf16 %v1234_v11, %v1204_v42 }
 0x2da   : > { %v604_v17 = vadd.f32 %v1222_v59, %v603_v12 }
 0x2dc   : > { %v605_v18 = vadd.f32 %v1224_v62, %v604_v17 }
 0x2de   : > { %v606_v19 = vadd.f32 %v1226_v63, %v605_v18 }
 0x2df   : > { %1131 = vmatpush3.bf16.xpose.msra.mxu0 %v1128_v57 }
 0x2e0   : > { %1133 = vmatprep.subr.bf16.mxu0 %v1132_v61  ;;  %v607_v20 = vadd.f32 %v1228_v6, %v606_v19 }
 0x2e2   : > { %v608_v21 = vadd.f32 %v1230_v7, %v607_v20 }
 0x2e4   : > { %v609_v22 = vadd.f32 %v1232_v10, %v608_v21 }
 0x2e6   : > { %v610_v23 = vadd.f32 %v1204_v42, %v609_v22 }
 0x2e7   : > { %1135 = vmatpush3.bf16.xpose.msra.mxu0 %v1132_v61 }
 0x2e8   : > { %1137 = vmatprep.subr.bf16.mxu0 %v1136_v4  ;;  %v611_v24 = vadd.f32 %v1234_v11, %v610_v23 }
 0x2ea   : > { %v612_v25 = vrot.slane %v611_v24, 4 }
 0x2ec   : > { %v613_v26 = vadd.f32 %v612_v25, %v611_v24 }
 0x2ee   : > { %v614_v27 = vrot.slane %v613_v26, 2 }
 0x2ef   : > { %1139 = vmatpush3.bf16.xpose.msra.mxu0 %v1136_v4 }
 0x2f0   : > { %1141 = vmatprep.subr.bf16.mxu0 %v1140_v9  ;;  %v615_v28 = vadd.f32 %v614_v27, %v613_v26 }
 0x2f2   : > { %v616_v29 = vrot.slane %v615_v28, 1 }
 0x2f4   : > { %v617_v30 = vadd.f32 %v616_v29, %v615_v28 }
 0x2f6   : > { %1235 = vrcp.f32 %v617_v30 }
 0x2f7   : > { %1143 = vmatpush3.bf16.xpose.msra.mxu0 %v1140_v9 }
 0x2f8   : > { %1145 = vmatprep.subr.bf16.mxu0 %v1144_v13 }
 0x2ff   : > { %1147 = vmatpush3.bf16.xpose.msra.mxu0 %v1144_v13 }
 0x300   : > { %v1236_v31 = vpop.eup %1235  ;;  %1149 = vmatprep.subr.bf16.mxu0 %v1148_v14 }
 0x301   : > { %v619_v32 = vmul.f32 %v1236_v31, %v1500_v15  ;;  %v620_v33 = vmul.f32 %v1236_v31, %v1502_v16 }
 0x303   : > { %1099 = vmatprep.mubr.f32.mxu0 %v619_v32 }
 0x307   : > { %1151 = vmatpush3.bf16.xpose.msra.mxu0 %v1148_v14 }
 0x30e   : > { %1100 = vmatmul.mubr.f32.vlgmr.msra.gmra.mrb[0].mxu0 %v620_v33 }
 0x3e1   : > { %v1101_v35 = vpop.f32.mrb[0].mxu0 }
 0x3e2   : > { %v689_v36 = vpop.f32.mrb[1].mxu0 }
 0x3e3   : > { %1102 = vmatprep.subr.mxu1 %v689_v36 }
 0x3e4   : > { %1103 = vmatpush3.msra.mxu1 %v689_v36 }
 0x3e5   : > { %1107 = vmatprep.subr.mxu1 %v1101_v35  ;;  %1105 = vmatmul.mubr.msk.f32.vlgmr.msra.gmra.mrb[22].mxu1 %vm707_vm1, %v703_v37 }
 0x3e6   : > { %1108 = vmatpush3.msra.mxu1 %v1101_v35  ;;  %1109 = vmatprep.mubr.msk.f32.mxu1 %vm707_vm1, %v702_v34 }
 0x3e9   : > { %1110 = vmatmul.mubr.msk.f32.vlgmr.msra.gmra.mrb[24].mxu1 %vm707_vm1, %v703_v37 }
 0x4b8   : > { %v1106_v15 = vpop.f32.mrb[22].mxu1 }
 0x4b9   : > { %v786_v16 = vadd.f32 %v1106_v15, %v1484_v5  ;;  %v780_v38 = vpop.f32.mrb[23].mxu1 }
 0x4ba   : > { %v781_v39 = vadd.f32 %v780_v38, %v1480_v3 }
 0x4bb   : > { %790 = vst [vmem:[%s188_s27 + $0x10] sm:$0xff] %v786_v16 }
 0x4bc   : > { %789 = vst [vmem:[%s188_s27] sm:$0xff] %v781_v39  ;;  %v1111_v40 = vpop.f32.mrb[24].mxu1 }
 0x4bd   : > { %v866_v41 = vadd.f32 %v1111_v40, %v1478_v2  ;;  %v860_v5 = vpop.f32.mrb[25].mxu1 }
 0x4be   : > { %v861_v42 = vadd.f32 %v860_v5, %v1476_v1 }
 0x4bf   : > { %870 = vst [vmem:[%s188_s27 + $0x18] sm:$0xff] %v866_v41 }
 0x4c0   : > { %869 = vst [vmem:[%s188_s27 + $0x8] sm:$0xff] %v861_v42 }
 0x4c1   : > { %1280 = shalt.err (!%p1277_p2)
}
 0x4c2   : > { %s1281_s7 = scalar_lea.hbm %s1539_s9, 512  ;;  %s1285_s19 = scalar_lea.hbm %s1587_s3, 1024 }
 0x4c3   : > { %p1282_p4 = scmp.ne.s32.totalorder %s1539_s9, %s1281_s7  ;;  %p1286_p9 = scmp.lt.u32.totalorder %s1539_s9, %s1587_s3 }
 0x4c4   : > { %p1287_p1 = scmp.lt.u32.totalorder %s1285_s19, %s1281_s7  ;;  %p1289_p6 = scmp.lt.u32.totalorder %s1281_s7, %s1539_s9 }
 0x4c5   : > { %p1283_p5 = pnand %p1282_p4, %p1594_p11 }
 0x4c6   : > { %p1288_p3 = por %p1287_p1, %p1286_p9 }
 0x4c7   : > { %p1284_p7 = pneg %p1283_p5 }
 0x4c8   : > { %p1290_p12 = por %p1289_p6, %p1288_p3 }
 0x4ca   : > { %p1291_p13 = pnand %p1290_p12, %p1284_p7 }
 0x4cc   : > { %1294 = shalt.err (!%p1291_p13)
}
 0x4cd   : > { %s1340_s26 = smov 256   ;;  %s1341_s27 = smov 16  }
 0x4ce   : > { %1154 = dma.vmem_to_hbm [thread:$0]  (%p1594_p11), %s1533_s28, 512, %s1539_s9, %s872_s16, %s1340_s26, %s1340_s26, %s1341_s27  }
 0x4cf PF: > { %s900_s29 = sand.u32 1, %s1321_s12   ;;  %p1595_p8 = scmp.ne.s32.totalorder %s1592_s25, 0 }
 0x4d0   : > { %p1596_p10 = scmp.ge.s32.totalorder %s1333_s15, 2  ;;  %s901_s30 = scalar_lea.sflag [#allocation8], %s900_s29 }
 0x4d2   : > { %p1161_p0 = pnand %p1596_p10, %p1595_p8 }
 0x4d4   : > { %1316 = dma.done.wait (!%p1161_p0), %s901_s30, 512  }
 0x4d5   : > { %1318 = vsyncadd (!%p1161_p0), %s901_s30, 4294966784  ;;  %p16_p2 = scmp.ge.s32.totalorder %s1387_s18, 4   ;;  %s1597_s12 = smov %s1325_s13 }
 0x4d6   : > { %s1598_s13 = smov %s1329_s14  ;;  %s1599_s14 = smov %s1399_s21 }
 0x4d7   : > { %s1600_s15 = smov %s1387_s18  ;;  %18 = sbr.rel (!%p16_p2) target bundleno = 5 (0x5), region = 77 }
 0x4de   :  { %906 = vsyncpa [#allocation7], 1 }
 0x4df   :  { %908 = vsyncpa [#allocation7 + $0x1], 1 }
 0x4e0   :  { %909 = vsyncpa [#allocation8], 1 }
 0x4e1   :  { %911 = vsyncpa [#allocation8 + $0x1], 1 }

</bundles_post_ra>
